<compile_context>
chip_gen: v6e
topology: v6e:2x2x1
jax: 0.10.0
libtpu: 0.0.40
codegen_flags: <defaults>
</compile_context>

<pallas_src>
import jax
import jax.numpy as jnp
from jax import lax
from jax.experimental import pallas as pl
from jax.experimental.pallas import tpu as pltpu


def basic_block_kernel(x_ref, b1_ref, b2_ref, w1_ref, w2_ref, out_ref,
                       apad_scr):
    """One batch-tile per grid step (grid axis is 'parallel').

    x_ref    : (NT, H, WC)    f32   lane-dense input tile (also the residual)
    b1_ref   : (1, WC)        f32   conv1 folded-BN bias, tiled across W
    b2_ref   : (1, WC)        f32   conv2 folded-BN bias, tiled across W
    w1_ref   : (3*WC, WC)     bf16  kh-concatenated banded conv1 weights
    w2_ref   : (3*WC, WC)     bf16  kh-concatenated banded conv2 weights
    out_ref  : (NT, H, WC)    f32
    apad_scr : (NT, H+2, WC)  f32   H-padded activation staging (reused by
                                    both convs)
    """
    NT, H, WC = x_ref.shape
    zrow = jnp.zeros((NT, 1, WC), jnp.float32)

    def conv_bn(a, w_ref):
        # Stage the activation with a per-image 1-row zero border in H (the W
        # zero border and kw shifts live inside the banded weights).  Borders
        # are re-zeroed on every call (never guarded by program_id), so images
        # folded into one grid step never leak into each other.
        apad_scr[:, 0:1, :] = zrow
        apad_scr[:, H + 1:H + 2, :] = zrow
        apad_scr[:, 1:H + 1, :] = a
        # Single M = NT*H, K = 3*WC bf16 MXU matmul: the three kh slices are
        # concatenated along the lane axis (128-aligned pieces), so there is
        # no per-kh accumulator, no zero init and no VPU adds.
        lhs = jnp.concatenate(
            [apad_scr[:, kh:kh + H, :].astype(jnp.bfloat16) for kh in range(3)],
            axis=2).reshape(NT * H, 3 * WC)
        return jnp.dot(lhs, w_ref[...], preferred_element_type=jnp.float32)

    x = x_ref[...]                                      # residual, stays f32

    # conv1 + bn1 (scale folded into weights, bias added here) + relu
    y1 = jnp.maximum(conv_bn(x, w1_ref) + b1_ref[...], 0.0)      # (NT*H, WC)

    # conv2 + bn2 + residual add (f32) + relu; lane-dense unmasked store
    y2 = conv_bn(y1.reshape(NT, H, WC), w2_ref)
    out = jnp.maximum(y2 + b2_ref[...] + x.reshape(NT * H, WC), 0.0)
    out_ref[...] = out.reshape(NT, H, WC)


def _banded_conv_weights(w_hwio, bn_scale, width):
    """Fold the per-output-channel BN scale into a 3x3 HWIO kernel and expand
    the width axis (including its pad=1 zero boundary) into banded matmul
    operands, concatenated along K over the three kernel rows.

    Returns (3*width*Cin, width*Cout) bf16 such that, with
        lhs[h, kh*width*Cin:(kh+1)*width*Cin] = x[h+kh-1, :]   (zero outside H)
    the product lhs @ W reproduces conv3x3(stride=1, pad=1) with the BN scale
    applied.
    """
    n_kh, n_kw, cin, cout = w_hwio.shape
    w = (w_hwio * bn_scale.reshape(1, 1, 1, cout)).astype(jnp.float32)
    bands = []
    for kh in range(n_kh):
        b = sum(jnp.kron(jnp.eye(width, k=1 - kw, dtype=jnp.float32), w[kh, kw])
                for kw in range(n_kw))
        bands.append(b)
    return (jnp.stack(bands)
            .reshape(n_kh * width * cin, width * cout)
            .astype(jnp.bfloat16))


def basic_block(x_nchw, w1, w2, s1, b1, s2, b2):
    """Wrapper: NCHW in / NCHW out.  w1, w2 are HWIO (3,3,C,C); s*/b* are (C,)
    folded eval-mode BatchNorm scale/bias."""
    x = jnp.transpose(x_nchw, (0, 2, 3, 1)).astype(jnp.float32)    # NHWC
    N, H, W, C = x.shape
    WC = W * C
    x_flat = x.reshape(N, H, WC)                                   # lane-dense

    w1c = _banded_conv_weights(w1, s1, W)                          # (3*WC, WC)
    w2c = _banded_conv_weights(w2, s2, W)
    b1f = jnp.tile(b1, W).reshape(1, WC).astype(jnp.float32)
    b2f = jnp.tile(b2, W).reshape(1, WC).astype(jnp.float32)

    # Fold the batch into the matmul M dimension: each grid step handles
    # n_tile images (M = n_tile*H, targeting ~256 MXU rows).  For the demo
    # (N=2, H=16) this collapses the grid to a single step; larger batches
    # keep >= 2 'parallel' steps so v7x's two TensorCores both get work.
    n_tile = min(N, max(1, 256 // H))
    while N % n_tile != 0:
        n_tile -= 1
    grid = (N // n_tile,)

    out_flat = pl.pallas_call(
        basic_block_kernel,
        out_shape=jax.ShapeDtypeStruct((N, H, WC), jnp.float32),
        grid_spec=pltpu.PrefetchScalarGridSpec(
            num_scalar_prefetch=0,
            grid=grid,
            in_specs=[
                pl.BlockSpec((n_tile, H, WC), lambda i: (i, 0, 0)),  # x (+res)
                pl.BlockSpec((1, WC), lambda i: (0, 0)),             # bn1 bias
                pl.BlockSpec((1, WC), lambda i: (0, 0)),             # bn2 bias
                # TODO(synk): single-buffer these constant-index weights at
                # real shapes (pipeline_mode=pl.Buffered(1)); at demo scale the
                # double-buffered footprint is only 4 x 96 KiB.
                pl.BlockSpec((3 * WC, WC), lambda i: (0, 0)),        # banded w1
                pl.BlockSpec((3 * WC, WC), lambda i: (0, 0)),        # banded w2
            ],
            out_specs=pl.BlockSpec((n_tile, H, WC), lambda i: (i, 0, 0)),
            scratch_shapes=[pltpu.VMEM((n_tile, H + 2, WC), jnp.float32)],
        ),
        # Batch tiles are independent (scratch borders re-zeroed every conv),
        # so the grid axis can be sharded across TensorCores on v7x.
        compiler_params=pltpu.CompilerParams(
            dimension_semantics=("parallel",)),
    )(x_flat, b1f, b2f, w1c, w2c)

    out = out_flat.reshape(N, H, W, C)
    return jnp.transpose(out, (0, 3, 1, 2))                        # back to NCHW


def ref_forward(x_nchw, w1, w2, s1, b1, s2, b2):
    """Pure-JAX f32 reference (same folded-BN semantics) for verification."""
    x = jnp.transpose(x_nchw, (0, 2, 3, 1)).astype(jnp.float32)

    def conv(inp, w):
        return lax.conv_general_dilated(
            inp, w, window_strides=(1, 1), padding=((1, 1), (1, 1)),
            dimension_numbers=('NHWC', 'HWIO', 'NHWC'))

    o = jnp.maximum(conv(x, w1) * s1 + b1, 0.0)
    o = conv(o, w2) * s2 + b2 + x
    o = jnp.maximum(o, 0.0)
    return jnp.transpose(o, (0, 3, 1, 2))


if __name__ == "__main__":
    # BasicBlock without downsample requires inplanes == planes, stride == 1.
    # C=8, W=16 -> W*C = 128 maps exactly onto the 128-lane axis.
    N, C, H, W = 2, 8, 16, 16
    key = jax.random.PRNGKey(0)
    kx, kw1, kw2, kg1, kb1, km1, kv1, kg2, kb2, km2, kv2 = jax.random.split(key, 11)

    x = jax.random.normal(kx, (N, C, H, W), jnp.float32)

    # conv weights, generated directly in HWIO layout (3,3,Cin,Cout)
    w1 = jax.random.normal(kw1, (3, 3, C, C), jnp.float32) * 0.1
    w2 = jax.random.normal(kw2, (3, 3, C, C), jnp.float32) * 0.1

    eps = 1e-5
    gamma1 = jax.random.normal(kg1, (C,), jnp.float32) * 0.1 + 1.0
    beta1 = jax.random.normal(kb1, (C,), jnp.float32) * 0.1
    rmean1 = jax.random.normal(km1, (C,), jnp.float32) * 0.1
    rvar1 = jnp.abs(jax.random.normal(kv1, (C,), jnp.float32)) * 0.1 + 0.5
    gamma2 = jax.random.normal(kg2, (C,), jnp.float32) * 0.1 + 1.0
    beta2 = jax.random.normal(kb2, (C,), jnp.float32) * 0.1
    rmean2 = jax.random.normal(km2, (C,), jnp.float32) * 0.1
    rvar2 = jnp.abs(jax.random.normal(kv2, (C,), jnp.float32)) * 0.1 + 0.5

    # fold eval-mode BN into per-channel scale/bias, shaped (C,)
    s1 = gamma1 / jnp.sqrt(rvar1 + eps)
    b1 = beta1 - rmean1 * s1
    s2 = gamma2 / jnp.sqrt(rvar2 + eps)
    b2 = beta2 - rmean2 * s2

    out = basic_block(x, w1, w2, s1, b1, s2, b2)
    out = jax.block_until_ready(out)

    ref = jax.block_until_ready(ref_forward(x, w1, w2, s1, b1, s2, b2))
    assert out.shape == (N, C, H, W)
    # bf16 matmul operands (f32 accumulation) and a bf16 inter-conv activation
    # vs an all-f32 reference: tolerance loosened accordingly.
    assert jnp.allclose(out, ref, rtol=5e-2, atol=5e-2), "mismatch vs reference"

    print("KERNEL_OK")
</pallas_src>

<mosaic_0001>
module attributes {stable_mosaic.version = 11 : i64} {
  func.func @basic_block_kernel(%arg0: i32, %arg1: memref<2x16x128xf32, #tpu.memory_space<vmem>>, %arg2: memref<1x128xf32, #tpu.memory_space<vmem>>, %arg3: memref<1x128xf32, #tpu.memory_space<vmem>>, %arg4: memref<384x128xbf16, #tpu.memory_space<vmem>>, %arg5: memref<384x128xbf16, #tpu.memory_space<vmem>>, %arg6: memref<2x16x128xf32, #tpu.memory_space<vmem>>, %arg7: memref<2x18x128xf32, #tpu.memory_space<vmem>>) attributes {dimension_semantics = [#tpu.dimension_semantics<parallel>], iteration_bounds = array<i64: 1>, scalar_prefetch = 0 : i64, scratch_operands = 1 : i64, tpu.core_type = #tpu.core_type<tc>, window_params = [{transform_indices = @transform_0, window_bounds = array<i64: 2, 16, 128>}, {pipeline_mode = #tpu.pipeline_mode<synchronous>, transform_indices = @transform_1, window_bounds = array<i64: 1, 128>}, {pipeline_mode = #tpu.pipeline_mode<synchronous>, transform_indices = @transform_2, window_bounds = array<i64: 1, 128>}, {pipeline_mode = #tpu.pipeline_mode<synchronous>, transform_indices = @transform_3, window_bounds = array<i64: 384, 128>}, {pipeline_mode = #tpu.pipeline_mode<synchronous>, transform_indices = @transform_4, window_bounds = array<i64: 384, 128>}, {transform_indices = @transform_5, window_bounds = array<i64: 2, 16, 128>}]} {
    %cst = arith.constant 0.000000e+00 : f32
    %0 = vector.broadcast %cst : f32 to vector<2x1x128xf32>
    %c0 = arith.constant 0 : index
    %c0_0 = arith.constant 0 : index
    %c0_1 = arith.constant 0 : index
    %1 = vector.load %arg1[%c0, %c0_0, %c0_1] : memref<2x16x128xf32, #tpu.memory_space<vmem>>, vector<2x16x128xf32>
    %c0_2 = arith.constant 0 : index
    %c0_3 = arith.constant 0 : index
    %c0_4 = arith.constant 0 : index
    %2 = vector.load %arg7[%c0_2, %c0_3, %c0_4] : memref<2x18x128xf32, #tpu.memory_space<vmem>>, vector<2x1x128xf32>
    tpu.vector_store %arg7[%c0_2, %c0_3, %c0_4], %0 {strides = array<i32>} : memref<2x18x128xf32, #tpu.memory_space<vmem>>, vector<2x1x128xf32>,
    %c0_5 = arith.constant 0 : index
    %c17 = arith.constant 17 : index
    %c0_6 = arith.constant 0 : index
    %3 = vector.load %arg7[%c0_5, %c17, %c0_6] : memref<2x18x128xf32, #tpu.memory_space<vmem>>, vector<2x1x128xf32>
    tpu.vector_store %arg7[%c0_5, %c17, %c0_6], %0 {strides = array<i32>} : memref<2x18x128xf32, #tpu.memory_space<vmem>>, vector<2x1x128xf32>,
    %c0_7 = arith.constant 0 : index
    %c1 = arith.constant 1 : index
    %c0_8 = arith.constant 0 : index
    %4 = vector.load %arg7[%c0_7, %c1, %c0_8] : memref<2x18x128xf32, #tpu.memory_space<vmem>>, vector<2x16x128xf32>
    tpu.vector_store %arg7[%c0_7, %c1, %c0_8], %1 {strides = array<i32>} : memref<2x18x128xf32, #tpu.memory_space<vmem>>, vector<2x16x128xf32>,
    %c0_9 = arith.constant 0 : index
    %c0_10 = arith.constant 0 : index
    %c0_11 = arith.constant 0 : index
    %5 = vector.load %arg7[%c0_9, %c0_10, %c0_11] : memref<2x18x128xf32, #tpu.memory_space<vmem>>, vector<2x16x128xf32>
    %6 = arith.truncf %5 : vector<2x16x128xf32> to vector<2x16x128xbf16>
    %c0_12 = arith.constant 0 : index
    %c1_13 = arith.constant 1 : index
    %c0_14 = arith.constant 0 : index
    %7 = vector.load %arg7[%c0_12, %c1_13, %c0_14] : memref<2x18x128xf32, #tpu.memory_space<vmem>>, vector<2x16x128xf32>
    %8 = arith.truncf %7 : vector<2x16x128xf32> to vector<2x16x128xbf16>
    %c0_15 = arith.constant 0 : index
    %c2 = arith.constant 2 : index
    %c0_16 = arith.constant 0 : index
    %9 = vector.load %arg7[%c0_15, %c2, %c0_16] : memref<2x18x128xf32, #tpu.memory_space<vmem>>, vector<2x16x128xf32>
    %10 = arith.truncf %9 : vector<2x16x128xf32> to vector<2x16x128xbf16>
    %11 = tpu.concatenate %6, %8, %10 in 2 : vector<2x16x128xbf16>, vector<2x16x128xbf16>, vector<2x16x128xbf16> -> vector<2x16x384xbf16>
    %12 = vector.shape_cast %11 : vector<2x16x384xbf16> to vector<32x384xbf16>
    %c0_17 = arith.constant 0 : index
    %c0_18 = arith.constant 0 : index
    %13 = vector.load %arg4[%c0_17, %c0_18] : memref<384x128xbf16, #tpu.memory_space<vmem>>, vector<384x128xbf16>
    %cst_19 = arith.constant dense<0.000000e+00> : vector<32x128xf32>
    %14 = tpu.matmul %12, %13, %cst_19 {dimension_numbers = #tpu.dot_dimension_numbers<[1], [0], [0], [1], [0, 0, 1, 1], [], []>} : vector<32x384xbf16>, vector<384x128xbf16>, vector<32x128xf32> -> vector<32x128xf32>
    %c0_20 = arith.constant 0 : index
    %c0_21 = arith.constant 0 : index
    %15 = vector.load %arg2[%c0_20, %c0_21] : memref<1x128xf32, #tpu.memory_space<vmem>>, vector<1x128xf32>
    %16 = vector.broadcast %15 : vector<1x128xf32> to vector<32x128xf32>
    %17 = arith.addf %14, %16 : vector<32x128xf32>
    %cst_22 = arith.constant 0.000000e+00 : f32
    %18 = vector.broadcast %cst_22 : f32 to vector<32x128xf32>
    %19 = arith.maximumf %17, %18 : vector<32x128xf32>
    %20 = vector.shape_cast %19 : vector<32x128xf32> to vector<2x16x128xf32>
    %c0_23 = arith.constant 0 : index
    %c0_24 = arith.constant 0 : index
    %c0_25 = arith.constant 0 : index
    %21 = vector.load %arg7[%c0_23, %c0_24, %c0_25] : memref<2x18x128xf32, #tpu.memory_space<vmem>>, vector<2x1x128xf32>
    tpu.vector_store %arg7[%c0_23, %c0_24, %c0_25], %0 {strides = array<i32>} : memref<2x18x128xf32, #tpu.memory_space<vmem>>, vector<2x1x128xf32>,
    %c0_26 = arith.constant 0 : index
    %c17_27 = arith.constant 17 : index
    %c0_28 = arith.constant 0 : index
    %22 = vector.load %arg7[%c0_26, %c17_27, %c0_28] : memref<2x18x128xf32, #tpu.memory_space<vmem>>, vector<2x1x128xf32>
    tpu.vector_store %arg7[%c0_26, %c17_27, %c0_28], %0 {strides = array<i32>} : memref<2x18x128xf32, #tpu.memory_space<vmem>>, vector<2x1x128xf32>,
    %c0_29 = arith.constant 0 : index
    %c1_30 = arith.constant 1 : index
    %c0_31 = arith.constant 0 : index
    %23 = vector.load %arg7[%c0_29, %c1_30, %c0_31] : memref<2x18x128xf32, #tpu.memory_space<vmem>>, vector<2x16x128xf32>
    tpu.vector_store %arg7[%c0_29, %c1_30, %c0_31], %20 {strides = array<i32>} : memref<2x18x128xf32, #tpu.memory_space<vmem>>, vector<2x16x128xf32>,
    %c0_32 = arith.constant 0 : index
    %c0_33 = arith.constant 0 : index
    %c0_34 = arith.constant 0 : index
    %24 = vector.load %arg7[%c0_32, %c0_33, %c0_34] : memref<2x18x128xf32, #tpu.memory_space<vmem>>, vector<2x16x128xf32>
    %25 = arith.truncf %24 : vector<2x16x128xf32> to vector<2x16x128xbf16>
    %c0_35 = arith.constant 0 : index
    %c1_36 = arith.constant 1 : index
    %c0_37 = arith.constant 0 : index
    %26 = vector.load %arg7[%c0_35, %c1_36, %c0_37] : memref<2x18x128xf32, #tpu.memory_space<vmem>>, vector<2x16x128xf32>
    %27 = arith.truncf %26 : vector<2x16x128xf32> to vector<2x16x128xbf16>
    %c0_38 = arith.constant 0 : index
    %c2_39 = arith.constant 2 : index
    %c0_40 = arith.constant 0 : index
    %28 = vector.load %arg7[%c0_38, %c2_39, %c0_40] : memref<2x18x128xf32, #tpu.memory_space<vmem>>, vector<2x16x128xf32>
    %29 = arith.truncf %28 : vector<2x16x128xf32> to vector<2x16x128xbf16>
    %30 = tpu.concatenate %25, %27, %29 in 2 : vector<2x16x128xbf16>, vector<2x16x128xbf16>, vector<2x16x128xbf16> -> vector<2x16x384xbf16>
    %31 = vector.shape_cast %30 : vector<2x16x384xbf16> to vector<32x384xbf16>
    %c0_41 = arith.constant 0 : index
    %c0_42 = arith.constant 0 : index
    %32 = vector.load %arg5[%c0_41, %c0_42] : memref<384x128xbf16, #tpu.memory_space<vmem>>, vector<384x128xbf16>
    %cst_43 = arith.constant dense<0.000000e+00> : vector<32x128xf32>
    %33 = tpu.matmul %31, %32, %cst_43 {dimension_numbers = #tpu.dot_dimension_numbers<[1], [0], [0], [1], [0, 0, 1, 1], [], []>} : vector<32x384xbf16>, vector<384x128xbf16>, vector<32x128xf32> -> vector<32x128xf32>
    %c0_44 = arith.constant 0 : index
    %c0_45 = arith.constant 0 : index
    %34 = vector.load %arg3[%c0_44, %c0_45] : memref<1x128xf32, #tpu.memory_space<vmem>>, vector<1x128xf32>
    %35 = vector.broadcast %34 : vector<1x128xf32> to vector<32x128xf32>
    %36 = arith.addf %33, %35 : vector<32x128xf32>
    %37 = vector.shape_cast %1 : vector<2x16x128xf32> to vector<32x128xf32>
    %38 = arith.addf %36, %37 : vector<32x128xf32>
    %cst_46 = arith.constant 0.000000e+00 : f32
    %39 = vector.broadcast %cst_46 : f32 to vector<32x128xf32>
    %40 = arith.maximumf %38, %39 : vector<32x128xf32>
    %41 = vector.shape_cast %40 : vector<32x128xf32> to vector<2x16x128xf32>
    %c0_47 = arith.constant 0 : index
    %c0_48 = arith.constant 0 : index
    %c0_49 = arith.constant 0 : index
    %42 = vector.load %arg6[%c0_47, %c0_48, %c0_49] : memref<2x16x128xf32, #tpu.memory_space<vmem>>, vector<2x16x128xf32>
    tpu.vector_store %arg6[%c0_47, %c0_48, %c0_49], %41 {strides = array<i32>} : memref<2x16x128xf32, #tpu.memory_space<vmem>>, vector<2x16x128xf32>,
    return
  }
  func.func @transform_0(%arg0: i32) -> (i32, i32, i32) {
    %c0_i32 = arith.constant 0 : i32
    %c0_i32_0 = arith.constant 0 : i32
    %c0_i32_1 = arith.constant 0 : i32
    return %arg0, %c0_i32, %c0_i32_0 : i32, i32, i32
  }
  func.func @transform_1(%arg0: i32) -> (i32, i32) {
    %c0_i32 = arith.constant 0 : i32
    %c0_i32_0 = arith.constant 0 : i32
    %c0_i32_1 = arith.constant 0 : i32
    return %c0_i32, %c0_i32_0 : i32, i32
  }
  func.func @transform_2(%arg0: i32) -> (i32, i32) {
    %c0_i32 = arith.constant 0 : i32
    %c0_i32_0 = arith.constant 0 : i32
    %c0_i32_1 = arith.constant 0 : i32
    return %c0_i32, %c0_i32_0 : i32, i32
  }
  func.func @transform_3(%arg0: i32) -> (i32, i32) {
    %c0_i32 = arith.constant 0 : i32
    %c0_i32_0 = arith.constant 0 : i32
    %c0_i32_1 = arith.constant 0 : i32
    return %c0_i32, %c0_i32_0 : i32, i32
  }
  func.func @transform_4(%arg0: i32) -> (i32, i32) {
    %c0_i32 = arith.constant 0 : i32
    %c0_i32_0 = arith.constant 0 : i32
    %c0_i32_1 = arith.constant 0 : i32
    return %c0_i32, %c0_i32_0 : i32, i32
  }
  func.func @transform_5(%arg0: i32) -> (i32, i32, i32) {
    %c0_i32 = arith.constant 0 : i32
    %c0_i32_0 = arith.constant 0 : i32
    %c0_i32_1 = arith.constant 0 : i32
    return %arg0, %c0_i32, %c0_i32_0 : i32, i32, i32
  }
}

</mosaic_0001>

<bundles_post_ra>
// kernel: tpu_custom_call.1
= control target key start
LH: loop header
LB: loop body
LE: loop exit
PB: predicated region body
PF: predicated region fallthrough
CT: control target
= control target key end

     0   :  { %10 = vsyncpa [#allocation4], 0  ;;  %s1147_s0 = inlined_call_operand.hbm [shape: f32[2,16,128], index: 0, kind: input, shape index: {}]   ;;  %s1148_s1 = inlined_call_operand.vmem [shape: f32[1,128], index: 1, kind: input, shape index: {}]   ;;  %s1149_s2 = inlined_call_operand.vmem [shape: f32[1,128], index: 2, kind: input, shape index: {}]   ;;  %s1150_s3 = inlined_call_operand.hbm [shape: bf16[384,128], index: 3, kind: input, shape index: {}]   ;;  %s1151_s4 = inlined_call_operand.hbm [shape: bf16[384,128], index: 4, kind: input, shape index: {}]   ;;  %s1152_s5 = inlined_call_operand.hbm [shape: f32[2,16,128], index: 5, kind: output, shape index: {}]  }
   0x1   :  { %11 = vsyncpa [#allocation7], 0 }
   0x2   :  { %12 = vsyncpa [#allocation5], 0  ;;  %s1056_s18 = smov [#allocation6]  }
   0x3   :  { %s34_s19 = sshll.u32 %s1056_s18, 4  ;;  %s35_s19 = int_to_ptr.vmem [resolvable:$true] %s34_s19 }
   0x4   :  { %s978_s20 = scalar_lea.vmem %s35_s19, 3072  ;;  %p983_p1 = scmp.lt.s32.totalorder %s35_s19, %s35_s19 }
   0x5   :  { %p979_p0 = scmp.ne.s32.totalorder %s35_s19, %s978_s20  ;;  %p984_p2 = scmp.lt.s32.totalorder %s978_s20, %s978_s20 }
   0x7   :  { %p985_p3 = por %p984_p2, %p983_p1 }
   0x9   :  { %p986_p4 = pnand %p985_p3, %p979_p0 }
   0xb   :  { %989 = shalt.err (!%p986_p4)
}
   0xc   :  { %s1057_s21 = smov 64   ;;  %s1058_s22 = smov 4  }
   0xd   :  { %40 = dma.hbm_to_vmem [thread:$0]  %s1150_s3, 3072, %s35_s19, [#allocation7], %s1057_s21, %s1057_s21, %s1058_s22  }
   0xe   :  { %s1059_s25 = smov [#allocation3]  }
   0xf   :  { %s18_s26 = sshll.u32 %s1059_s25, 4  ;;  %s19_s26 = int_to_ptr.vmem [resolvable:$true] %s18_s26 }
  0x10   :  { %s998_s27 = scalar_lea.vmem %s19_s26, 512  ;;  %p1003_p6 = scmp.lt.s32.totalorder %s19_s26, %s19_s26 }
  0x11   :  { %p999_p5 = scmp.ne.s32.totalorder %s19_s26, %s998_s27  ;;  %p1004_p7 = scmp.lt.s32.totalorder %s998_s27, %s998_s27 }
  0x13   :  { %p1005_p8 = por %p1004_p7, %p1003_p6 }
  0x15   :  { %p1006_p9 = pnand %p1005_p8, %p999_p5 }
  0x17   :  { %1009 = shalt.err (!%p1006_p9)
}
  0x18   :  { %s1060_s28 = smov 128   ;;  %s1061_s29 = smov 8  }
  0x19   :  { %24 = dma.hbm_to_vmem [thread:$0]  %s1147_s0, 512, %s19_s26, [#allocation4], %s1060_s28, %s1060_s28, %s1061_s29  }
  0x1a   :  { %s1062_s3 = smov [#allocation8]  }
  0x1b   :  { %s46_s7 = sshll.u32 %s1062_s3, 4  ;;  %s47_s7 = int_to_ptr.vmem [resolvable:$true] %s46_s7 }
  0x1c   :  { %s1018_s8 = scalar_lea.vmem %s47_s7, 3072  ;;  %p1023_p11 = scmp.lt.s32.totalorder %s47_s7, %s47_s7 }
  0x1d   :  { %p1019_p10 = scmp.ne.s32.totalorder %s47_s7, %s1018_s8  ;;  %p1024_p12 = scmp.lt.s32.totalorder %s1018_s8, %s1018_s8 }
  0x1f   :  { %p1025_p13 = por %p1024_p12, %p1023_p11 }
  0x21   :  { %p1026_p0 = pnand %p1025_p13, %p1019_p10 }
  0x23   :  { %1029 = shalt.err (!%p1026_p0)
}
  0x24   :  { %52 = dma.hbm_to_vmem [thread:$0]  %s1151_s4, 3072, %s47_s7, [#allocation7], %s1057_s21, %s1057_s21, %s1058_s22  }
  0x25   :  { %1050 = dma.done.wait [#allocation4], 512  }
  0x26   :  { %1051 = vsyncadd [#allocation4], 4294966784 }
  0x27   :  { %1052 = dma.done.wait [#allocation7], 6144  }
  0x28   :  { %1053 = vsyncadd [#allocation7], 4294961152  ;;  %v1063_v0 = vmov 0.0   ;;  %v922_v1 = vld [vmem:[#allocation6 + $0x78] sm:$0xff]   ;;  %v925_v4 = vld [vmem:[#allocation6 + $0x70] sm:$0xff]  }
  0x29   :  { %69 = vst [vmem:[#allocation2 + $0x11] sm:$0x1] %v1063_v0  ;;  %67 = vst [vmem:[#allocation2] sm:$0x1] %v1063_v0  ;;  %v923_v2 = vld [vmem:[#allocation6 + $0xb8] sm:$0xff]   ;;  %797 = vmatprep.subr.bf16.mxu0 %v922_v1  ;;  %v926_v5 = vld [vmem:[#allocation6 + $0xb0] sm:$0xff]  }
  0x2a   :  { %68 = vst [vmem:[#allocation2 + $0x18] sm:$0x1] %v1063_v0  ;;  %70 = vst [vmem:[#allocation2 + $0x29] sm:$0x1] %v1063_v0  ;;  %v924_v3 = vld [vmem:[#allocation6 + $0x38] sm:$0xff]   ;;  %873 = vmatprep.subr.bf16.mxu1 %v923_v2  ;;  %v927_v6 = vld [vmem:[#allocation6 + $0x30] sm:$0xff]  }
  0x2b   :  { %798 = vmatpush3.bf16.msra.mxu0 %v924_v3  ;;  %874 = vmatpush3.bf16.msra.mxu1 %v923_v2  ;;  %v928_v7 = vld [vmem:[#allocation6 + $0x68] sm:$0xff]   ;;  %v931_v10 = vld [vmem:[#allocation6 + $0x60] sm:$0xff]   ;;  %v934_v13 = vld [vmem:[#allocation6 + $0x58] sm:$0xff]  }
  0x2c   :  { %799 = vmatprep.subr.bf16.mxu0 %v925_v4  ;;  %875 = vmatprep.subr.bf16.mxu1 %v926_v5  ;;  %v929_v8 = vld [vmem:[#allocation6 + $0xa8] sm:$0xff]   ;;  %v932_v11 = vld [vmem:[#allocation6 + $0xa0] sm:$0xff]   ;;  %v935_v14 = vld [vmem:[#allocation6 + $0x98] sm:$0xff]  }
  0x2d   :  { %v930_v9 = vld [vmem:[#allocation6 + $0x28] sm:$0xff]   ;;  %v933_v12 = vld [vmem:[#allocation6 + $0x20] sm:$0xff]   ;;  %v936_v15 = vld [vmem:[#allocation6 + $0x18] sm:$0xff]  }
  0x2e   :  { %v937_v16 = vld [vmem:[#allocation6 + $0x50] sm:$0xff]   ;;  %v940_v19 = vld [vmem:[#allocation6 + $0x48] sm:$0xff]   ;;  %v943_v22 = vld [vmem:[#allocation6 + $0x40] sm:$0xff]  }
  0x2f   :  { %800 = vmatpush3.bf16.msra.mxu0 %v927_v6  ;;  %876 = vmatpush3.bf16.msra.mxu1 %v926_v5  ;;  %v938_v17 = vld [vmem:[#allocation6 + $0x90] sm:$0xff]   ;;  %v941_v20 = vld [vmem:[#allocation6 + $0x88] sm:$0xff]   ;;  %v944_v23 = vld [vmem:[#allocation6 + $0x80] sm:$0xff]  }
  0x30   :  { %801 = vmatprep.subr.bf16.mxu0 %v928_v7  ;;  %877 = vmatprep.subr.bf16.mxu1 %v929_v8  ;;  %v939_v18 = vld [vmem:[#allocation6 + $0x10] sm:$0xff]   ;;  %v942_v21 = vld [vmem:[#allocation6 + $0x8] sm:$0xff]   ;;  %v1111_v24 = vld [vmem:[#allocation3] sm:$0xff] }
  0x31   :  { %v1113_v25 = vld [vmem:[#allocation3 + $0x8] sm:$0xff]  ;;  %v1115_v26 = vld [vmem:[#allocation3 + $0x10] sm:$0xff]  ;;  %71 = vst [vmem:[#allocation2 + $0x1] sm:$0xff] %v1111_v24  ;;  %v1121_v28 = vld [vmem:[#allocation3 + $0x18] sm:$0xff] }
  0x32   :  { %72 = vst [vmem:[#allocation2 + $0x9] sm:$0xff] %v1113_v25  ;;  %v85_v27 = vpack.c.bf16 %v1113_v25, %v1111_v24  ;;  %73 = vst [vmem:[#allocation2 + $0x19] sm:$0xff] %v1115_v26  ;;  %v945_v29 = vld [vmem:[#allocation6] sm:$0xff]   ;;  %v946_v30 = vld [vmem:[#allocation8 + $0x78] sm:$0xff]   ;;  %v86_v39 = vpack.c.bf16 %v1121_v28, %v1115_v26 }
  0x33   :  { %802 = vmatpush3.bf16.msra.mxu0 %v930_v9  ;;  %878 = vmatpush3.bf16.msra.mxu1 %v929_v8  ;;  %74 = vst [vmem:[#allocation2 + $0x21] sm:$0xff] %v1121_v28  ;;  %v947_v31 = vld [vmem:[#allocation8 + $0x38] sm:$0xff]   ;;  %v948_v43 = vld [vmem:[#allocation8 + $0x70] sm:$0xff]   ;;  %v951_v48 = vld [vmem:[#allocation8 + $0x68] sm:$0xff]  }
  0x34   :  { %803 = vmatprep.subr.bf16.mxu0 %v931_v10  ;;  %879 = vmatprep.subr.bf16.mxu1 %v932_v11  ;;  %v949_v45 = vld [vmem:[#allocation8 + $0x30] sm:$0xff]   ;;  %v950_v47 = vld [vmem:[#allocation8 + $0xb8] sm:$0xff]   ;;  %v952_v49 = vld [vmem:[#allocation8 + $0x28] sm:$0xff]  }
  0x35   :  { %324 = vmatprep.mubr.bf16.mxu0 %v85_v27  ;;  %v953_v50 = vld [vmem:[#allocation8 + $0xb0] sm:$0xff]   ;;  %v954_v51 = vld [vmem:[#allocation8 + $0x60] sm:$0xff]   ;;  %v956_v53 = vld [vmem:[#allocation8 + $0xa8] sm:$0xff]  }
  0x36   :  { %v955_v52 = vld [vmem:[#allocation8 + $0x20] sm:$0xff]   ;;  %v957_v54 = vld [vmem:[#allocation8 + $0x58] sm:$0xff]   ;;  %v960_v57 = vld [vmem:[#allocation8 + $0x50] sm:$0xff]  }
  0x37   :  { %804 = vmatpush3.bf16.msra.mxu0 %v933_v12  ;;  %880 = vmatpush3.bf16.msra.mxu1 %v932_v11  ;;  %v958_v55 = vld [vmem:[#allocation8 + $0x18] sm:$0xff]   ;;  %v959_v56 = vld [vmem:[#allocation8 + $0xa0] sm:$0xff]   ;;  %v961_v58 = vld [vmem:[#allocation8 + $0x10] sm:$0xff]  }
  0x38   :  { %805 = vmatprep.subr.bf16.mxu0 %v934_v13  ;;  %881 = vmatprep.subr.bf16.mxu1 %v935_v14  ;;  %v75_v34 = vld [vmem:[#allocation2] sm:$0xff]  ;;  %v962_v59 = vld [vmem:[#allocation8 + $0x98] sm:$0xff]   ;;  %v963_v60 = vld [vmem:[#allocation8 + $0x48] sm:$0xff]  }
  0x39   :  { %v87_v32 = vld [vmem:[#allocation2 + $0x2] sm:$0xff]  ;;  %v88_v33 = vld [vmem:[#allocation2 + $0xa] sm:$0xff]  ;;  %394 = vst [vmem:[#allocation2] sm:$0x1] %v1063_v0  ;;  %v77_v42 = vld [vmem:[#allocation2 + $0x18] sm:$0xff] }
  0x3a   :  { %v91_v35 = vpack.c.bf16 %v88_v33, %v87_v32  ;;  %396 = vst [vmem:[#allocation2 + $0x11] sm:$0x1] %v1063_v0  ;;  %v76_v36 = vld [vmem:[#allocation2 + $0x8] sm:$0xff]  ;;  %v89_v37 = vld [vmem:[#allocation2 + $0x1a] sm:$0xff]  ;;  %395 = vst [vmem:[#allocation2 + $0x18] sm:$0x1] %v1063_v0 }
  0x3b   :  { %806 = vmatpush3.bf16.msra.mxu0 %v936_v15  ;;  %882 = vmatpush3.bf16.msra.mxu1 %v935_v14  ;;  %v90_v38 = vld [vmem:[#allocation2 + $0x22] sm:$0xff]  ;;  %v79_v40 = vpack.c.bf16 %v76_v36, %v75_v34  ;;  %v964_v61 = vld [vmem:[#allocation8 + $0x8] sm:$0xff]   ;;  %v966_v63 = vld [vmem:[#allocation8 + $0x40] sm:$0xff]  }
  0x3c   :  { %807 = vmatprep.subr.bf16.mxu0 %v937_v16  ;;  %883 = vmatprep.subr.bf16.mxu1 %v938_v17  ;;  %v92_v41 = vpack.c.bf16 %v90_v38, %v89_v37  ;;  %397 = vst [vmem:[#allocation2 + $0x29] sm:$0x1] %v1063_v0  ;;  %v78_v44 = vld [vmem:[#allocation2 + $0x20] sm:$0xff]  ;;  %v967_v0 = vld [vmem:[#allocation8] sm:$0xff]   ;;  %v968_v1 = vld [vmem:[#allocation8 + $0x88] sm:$0xff]  }
  0x3d   :  { %889 = vmatprep.mubr.bf16.mxu1 %v91_v35  ;;  %v80_v46 = vpack.c.bf16 %v78_v44, %v77_v42  ;;  %v965_v62 = vld [vmem:[#allocation8 + $0x90] sm:$0xff]   ;;  %v969_v2 = vld [vmem:[#allocation8 + $0x80] sm:$0xff]  }
  0x3e   :  { %v747_v6 = vld [vmem:[%s1148_s1] ss:$0 sm:$0xff] }
  0x3f   :  { %808 = vmatpush3.bf16.msra.mxu0 %v939_v18  ;;  %884 = vmatpush3.bf16.msra.mxu1 %v938_v17 }
  0x40   :  { %809 = vmatprep.subr.bf16.mxu0 %v940_v19  ;;  %885 = vmatprep.subr.bf16.mxu1 %v941_v20 }
  0x43   :  { %810 = vmatpush3.bf16.msra.mxu0 %v942_v21  ;;  %886 = vmatpush3.bf16.msra.mxu1 %v941_v20 }
  0x44   :  { %811 = vmatprep.subr.bf16.mxu0 %v943_v22  ;;  %887 = vmatprep.subr.bf16.mxu1 %v944_v23 }
  0x47   :  { %812 = vmatpush3.bf16.msra.mxu0 %v945_v29  ;;  %888 = vmatpush3.bf16.msra.mxu1 %v944_v23 }
  0x48   :  { %835 = vmatprep.subr.bf16.mxu0 %v946_v30  ;;  %893 = vmatprep.subr.bf16.mxu1 %v950_v47 }
  0x4a   :  { %325 = vmatmul.mubr.bf16.vlgmr.msra.gmra.mxu0 %v79_v40  ;;  %890 = vmatmul.mubr.bf16.vlgmr.msra.gmra.mxu1 %v92_v41 }
  0x4b   :  { %332 = vmatprep.mubr.bf16.mxu0 %v86_v39  ;;  %836 = vmatpush3.bf16.msra.mxu0 %v947_v31 }
  0x4c   :  { %837 = vmatprep.subr.bf16.mxu0 %v948_v43  ;;  %894 = vmatpush3.bf16.msra.mxu1 %v950_v47 }
  0x4d   :  { %895 = vmatprep.subr.bf16.mxu1 %v953_v50 }
  0x4f   :  { %838 = vmatpush3.bf16.msra.mxu0 %v949_v45 }
  0x50   :  { %839 = vmatprep.subr.bf16.mxu0 %v951_v48  ;;  %896 = vmatpush3.bf16.msra.mxu1 %v953_v50 }
  0x51   :  { %897 = vmatprep.subr.bf16.mxu1 %v956_v53 }
  0x52   :  { %333 = vmatmul.mubr.bf16.gmra.mxu0 %v80_v46 }
  0x53   :  { %840 = vmatpush3.bf16.msra.mxu0 %v952_v49 }
  0x54   :  { %841 = vmatprep.subr.bf16.mxu0 %v954_v51  ;;  %898 = vmatpush3.bf16.msra.mxu1 %v956_v53 }
  0x55   :  { %899 = vmatprep.subr.bf16.mxu1 %v959_v56 }
  0x57   :  { %842 = vmatpush3.bf16.msra.mxu0 %v955_v52 }
  0x58   :  { %843 = vmatprep.subr.bf16.mxu0 %v957_v54  ;;  %900 = vmatpush3.bf16.msra.mxu1 %v959_v56 }
  0x59   :  { %901 = vmatprep.subr.bf16.mxu1 %v962_v59 }
  0x5b   :  { %844 = vmatpush3.bf16.msra.mxu0 %v958_v55  ;;  %v772_v55 = vld [vmem:[%s1149_s2] ss:$0 sm:$0xff]  ;;  %s1064_s2 = smov [#allocation9]  }
  0x5c   :  { %845 = vmatprep.subr.bf16.mxu0 %v960_v57  ;;  %902 = vmatpush3.bf16.msra.mxu1 %v962_v59  ;;  %s734_s12 = sshll.u32 %s1064_s2, 4  ;;  %s735_s12 = int_to_ptr.vmem [resolvable:$true] %s734_s12 }
  0x5d   :  { %903 = vmatprep.subr.bf16.mxu1 %v965_v62  ;;  %s1030_s13 = scalar_lea.vmem %s735_s12, 512  ;;  %p1035_p2 = scmp.lt.s32.totalorder %s735_s12, %s735_s12 }
  0x5e   :  { %p1031_p1 = scmp.ne.s32.totalorder %s735_s12, %s1030_s13  ;;  %p1036_p3 = scmp.lt.s32.totalorder %s1030_s13, %s1030_s13 }
  0x5f   :  { %846 = vmatpush3.bf16.msra.mxu0 %v961_v58 }
  0x60   :  { %847 = vmatprep.subr.bf16.mxu0 %v963_v60  ;;  %904 = vmatpush3.bf16.msra.mxu1 %v965_v62  ;;  %p1037_p4 = por %p1036_p3, %p1035_p2 }
  0x61   :  { %905 = vmatprep.subr.bf16.mxu1 %v968_v1 }
  0x62   :  { %p1038_p5 = pnand %p1037_p4, %p1031_p1 }
  0x63   :  { %848 = vmatpush3.bf16.msra.mxu0 %v964_v61 }
  0x64   :  { %849 = vmatprep.subr.bf16.mxu0 %v966_v63  ;;  %906 = vmatpush3.bf16.msra.mxu1 %v968_v1 }
  0x65   :  { %907 = vmatprep.subr.bf16.mxu1 %v969_v2 }
  0x67   :  { %850 = vmatpush3.bf16.msra.mxu0 %v967_v0 }
  0x68   :  { %908 = vmatpush3.bf16.msra.mxu1 %v969_v2 }
 0x10a   :  { %v813_v3 = vpop.f32.mrf.mxu0  ;;  %v891_v4 = vpop.f32.mrf.mxu1 }
 0x10c   :  { %v814_v5 = vpop.f32.mrf.mxu0  ;;  %v375_v7 = vpop.f32.mrf.mxu1 }
 0x10d   :  { %v815_v8 = vadd.f32 %v814_v5, %v813_v3 }
 0x10e   :  { %v816_v9 = vpop.f32.mrf.mxu0  ;;  %v892_v11 = vpop.f32.mrf.mxu1 }
 0x10f   :  { %v327_v10 = vadd.f32 %v815_v8, %v747_v6 }
 0x110   :  { %v817_v12 = vpop.f32.mrf.mxu0  ;;  %v378_v18 = vpop.f32.mrf.mxu1 }
 0x111   :  { %v376_v13 = vadd.f32 %v375_v7, %v327_v10  ;;  %v818_v14 = vadd.f32 %v817_v12, %v816_v9 }
 0x112   :  { %v819_v15 = vpop.f32.mrf.mxu0 }
 0x113   :  { %v390_v16 = vmax.f32 %v376_v13, 0.0  ;;  %v330_v17 = vadd.f32 %v818_v14, %v747_v6 }
 0x114   :  { %v820_v19 = vpop.f32.mrf.mxu0 }
 0x115   :  { %398 = vst [vmem:[#allocation2 + $0x1] sm:$0xff] %v390_v16  ;;  %v379_v20 = vadd.f32 %v378_v18, %v330_v17  ;;  %v821_v21 = vadd.f32 %v820_v19, %v819_v15 }
 0x116   :  { %v822_v22 = vpop.f32.mrf.mxu0 }
 0x117   :  { %v391_v23 = vmax.f32 %v379_v20, 0.0  ;;  %v335_v27 = vadd.f32 %v821_v21, %v747_v6 }
 0x118   :  { %v823_v29 = vpop.f32.mrf.mxu0 }
 0x119   :  { %399 = vst [vmem:[#allocation2 + $0x9] sm:$0xff] %v391_v23  ;;  %v384_v30 = vadd.f32 %v891_v4, %v335_v27  ;;  %v824_v31 = vadd.f32 %v823_v29, %v822_v22  ;;  %v412_v32 = vpack.c.bf16 %v391_v23, %v390_v16 }
 0x11b   :  { %v392_v33 = vmax.f32 %v384_v30, 0.0  ;;  %v338_v34 = vadd.f32 %v824_v31, %v747_v6  ;;  %651 = vmatprep.mubr.bf16.mxu0 %v412_v32 }
 0x11c   :  { %v402_v37 = vld [vmem:[#allocation2] sm:$0xff] }
 0x11d   :  { %400 = vst [vmem:[#allocation2 + $0x19] sm:$0xff] %v392_v33  ;;  %v387_v35 = vadd.f32 %v892_v11, %v338_v34 }
 0x11f   :  { %v393_v36 = vmax.f32 %v387_v35, 0.0 }
 0x120   :  { %v414_v38 = vld [vmem:[#allocation2 + $0x2] sm:$0xff]  ;;  %v415_v39 = vld [vmem:[#allocation2 + $0xa] sm:$0xff] }
 0x121   :  { %v403_v40 = vld [vmem:[#allocation2 + $0x8] sm:$0xff]  ;;  %401 = vst [vmem:[#allocation2 + $0x21] sm:$0xff] %v393_v36  ;;  %v418_v41 = vpack.c.bf16 %v415_v39, %v414_v38  ;;  %v413_v43 = vpack.c.bf16 %v393_v36, %v392_v33 }
 0x122   :  { %v406_v42 = vpack.c.bf16 %v403_v40, %v402_v37 }
 0x123   :  { %909 = vmatprep.mubr.bf16.mxu1 %v418_v41 }
 0x124   :  { %652 = vmatmul.mubr.bf16.vlgmr.msra.gmra.mxu0 %v406_v42  ;;  %v404_v44 = vld [vmem:[#allocation2 + $0x18] sm:$0xff] }
 0x125   :  { %659 = vmatprep.mubr.bf16.mxu0 %v413_v43 }
 0x128   :  { %v416_v45 = vld [vmem:[#allocation2 + $0x1a] sm:$0xff]  ;;  %v417_v46 = vld [vmem:[#allocation2 + $0x22] sm:$0xff] }
 0x129   :  { %v405_v47 = vld [vmem:[#allocation2 + $0x20] sm:$0xff]  ;;  %v419_v48 = vpack.c.bf16 %v417_v46, %v416_v45 }
 0x12a   :  { %v407_v49 = vpack.c.bf16 %v405_v47, %v404_v44 }
 0x12b   :  { %910 = vmatmul.mubr.bf16.vlgmr.msra.gmra.mxu1 %v419_v48 }
 0x12c   :  { %660 = vmatmul.mubr.bf16.gmra.mxu0 %v407_v49 }
 0x1e4   :  { %v851_v50 = vpop.f32.mrf.mxu0 }
 0x1e6   :  { %v852_v51 = vpop.f32.mrf.mxu0 }
 0x1e7   :  { %v853_v53 = vadd.f32 %v852_v51, %v851_v50 }
 0x1e8   :  { %v854_v52 = vpop.f32.mrf.mxu0 }
 0x1e9   :  { %v654_v59 = vadd.f32 %v853_v53, %v772_v55 }
 0x1ea   :  { %v855_v54 = vpop.f32.mrf.mxu0 }
 0x1eb   :  { %v911_v56 = vpop.f32.mrf.mxu1  ;;  %v856_v58 = vadd.f32 %v855_v54, %v854_v52 }
 0x1ec   :  { %v857_v57 = vpop.f32.mrf.mxu0 }
 0x1ed   :  { %v702_v60 = vpop.f32.mrf.mxu1  ;;  %v657_v4 = vadd.f32 %v856_v58, %v772_v55 }
 0x1ee   :  { %v858_v61 = vpop.f32.mrf.mxu0  ;;  %v703_v62 = vadd.f32 %v702_v60, %v654_v59 }
 0x1ef   :  { %v859_v63 = vadd.f32 %v858_v61, %v857_v57  ;;  %v912_v0 = vpop.f32.mrf.mxu1 }
 0x1f0   :  { %v860_v1 = vpop.f32.mrf.mxu0  ;;  %v717_v2 = vadd.f32 %v703_v62, %v1111_v24 }
 0x1f1   :  { %v662_v3 = vadd.f32 %v859_v63, %v772_v55  ;;  %v705_v5 = vpop.f32.mrf.mxu1 }
 0x1f2   :  { %v861_v6 = vpop.f32.mrf.mxu0  ;;  %v721_v7 = vmax.f32 %v717_v2, 0.0  ;;  %v706_v9 = vadd.f32 %v705_v5, %v657_v4 }
 0x1f3   :  { %v711_v8 = vadd.f32 %v911_v56, %v662_v3  ;;  %v862_v10 = vadd.f32 %v861_v6, %v860_v1 }
 0x1f4   :  { %725 = vst [vmem:[#allocation9] sm:$0xff] %v721_v7  ;;  %v718_v12 = vadd.f32 %v706_v9, %v1113_v25 }
 0x1f5   :  { %v719_v11 = vadd.f32 %v711_v8, %v1115_v26  ;;  %v665_v13 = vadd.f32 %v862_v10, %v772_v55 }
 0x1f6   :  { %v722_v15 = vmax.f32 %v718_v12, 0.0 }
 0x1f7   :  { %v723_v14 = vmax.f32 %v719_v11, 0.0  ;;  %v714_v16 = vadd.f32 %v912_v0, %v665_v13 }
 0x1f8   :  { %726 = vst [vmem:[#allocation9 + $0x8] sm:$0xff] %v722_v15 }
 0x1f9   :  { %727 = vst [vmem:[#allocation9 + $0x10] sm:$0xff] %v723_v14  ;;  %v720_v24 = vadd.f32 %v714_v16, %v1121_v28 }
 0x1fb   :  { %v724_v17 = vmax.f32 %v720_v24, 0.0 }
 0x1fd   :  { %728 = vst [vmem:[#allocation9 + $0x18] sm:$0xff] %v724_v17 }
 0x1fe   :  { %1041 = shalt.err (!%p1038_p5)
}
 0x1ff   :  { %740 = dma.vmem_to_hbm [thread:$0]  %s735_s12, 512, %s1152_s5, [#allocation5], %s1060_s28, %s1060_s28, %s1061_s29  }
 0x200   :  { %1054 = dma.done.wait [#allocation5], 512  }
 0x201   :  { %1055 = vsyncadd [#allocation5], 4294966784 }
 0x202   :  { %744 = vsyncpa [#allocation4], 1 }
 0x203   :  { %745 = vsyncpa [#allocation7], 1 }
 0x204   :  { %746 = vsyncpa [#allocation5], 1 }

</bundles_post_ra>
